<compile_context>
chip_gen: v6e
topology: v6e:2x2x1
jax: 0.10.0
libtpu: 0.0.40
codegen_flags: <defaults>
</compile_context>

<pallas_src>
import functools

import jax
import jax.numpy as jnp
from jax.experimental import pallas as pl
from jax.experimental.pallas import tpu as pltpu

LANE = 128
_ACC_ROWS = 8       # one f32 vreg worth of sublanes (partial-sum accumulator)
_NCORE_SPLIT = 2    # partial-sum slots; maps to the 2 TensorCores on v7x


def _sublane_multiple(*dtypes):
    """Second-minor tiling requirement per dtype (f32->8, bf16->16, int8/fp8->32)."""
    mult = 8
    for dt in dtypes:
        mult = max(mult, {4: 8, 2: 16, 1: 32}.get(jnp.dtype(dt).itemsize, 8))
    return mult


def _nll_kernel(y_ref, m_ref, v_ref, part_ref, *, n_elems, tm, blocks_per_split):
    c = pl.program_id(0)          # partial-sum slot (parallel axis; TC on v7x)
    i = pl.program_id(1)          # row-block within this slot (reduction axis)

    @pl.when(i == 0)
    def _():
        part_ref[...] = jnp.zeros_like(part_ref)

    y = y_ref[...].astype(jnp.float32)
    m = m_ref[...].astype(jnp.float32)
    v = v_ref[...].astype(jnp.float32)

    diff = y - m
    nll = 0.5 * jnp.log(v) + 0.5 * (diff * diff) / v

    # In-kernel masking of the ragged tail (and of any nominal block past the
    # end of the array): compute each element's flat index and compare to n.
    blk = c * blocks_per_split + i                      # nominal row-block idx
    row0 = blk * tm
    row_idx = row0 + jax.lax.broadcasted_iota(jnp.int32, (tm, LANE), 0)
    lane_idx = jax.lax.broadcasted_iota(jnp.int32, (tm, LANE), 1)
    elem_idx = row_idx * LANE + lane_idx
    nll = jnp.where(elem_idx < n_elems, nll, 0.0)

    # Fold (tm, 128) -> (8, 128) with VPU adds only; defer the expensive
    # cross-lane/sublane reduce to the wrapper epilogue.
    part_ref[...] += jnp.sum(nll.reshape(tm // _ACC_ROWS, _ACC_ROWS, LANE), axis=0)


@functools.partial(jax.jit, static_argnames=("tm",))
def custom_nll(y, mean, var, *, tm=2048):
    """Pallas TPU implementation of CustomNLL.forward. Returns a scalar f32."""
    n = y.size
    assert mean.size == n and var.size == n

    yf = jnp.reshape(y, (-1,))
    mf = jnp.reshape(mean, (-1,))
    vf = jnp.reshape(var, (-1,))

    # Pad only to the next multiple of 128 lanes (needed for the 2-D layout);
    # padded elements are masked inside the kernel so their values don't matter.
    pad = (-n) % LANE
    if pad:
        yf = jnp.pad(yf, (0, pad))
        mf = jnp.pad(mf, (0, pad))
        vf = jnp.pad(vf, (0, pad), constant_values=1)

    rows = (n + pad) // LANE
    mult = _sublane_multiple(y.dtype, mean.dtype, var.dtype)

    # Clamp the tile to the input and round up to the sublane multiple.
    tm = min(tm, rows)
    tm = -(-tm // mult) * mult

    total_blocks = pl.cdiv(rows, tm)
    n_split = _NCORE_SPLIT if total_blocks >= _NCORE_SPLIT else 1
    blocks_per_split = pl.cdiv(total_blocks, n_split)

    def row_map(c, i):
        # Clamp so the DMA'd block start is always in-bounds; over-range steps
        # re-read the last block and are fully masked in the kernel.
        return (jnp.minimum(c * blocks_per_split + i, total_blocks - 1), 0)

    in_spec = pl.BlockSpec((tm, LANE), row_map)

    y2 = yf.reshape(rows, LANE)
    m2 = mf.reshape(rows, LANE)
    v2 = vf.reshape(rows, LANE)

    partials = pl.pallas_call(
        functools.partial(_nll_kernel, n_elems=n, tm=tm,
                          blocks_per_split=blocks_per_split),
        out_shape=jax.ShapeDtypeStruct((n_split * _ACC_ROWS, LANE), jnp.float32),
        grid_spec=pltpu.PrefetchScalarGridSpec(
            num_scalar_prefetch=0,
            grid=(n_split, blocks_per_split),
            in_specs=[in_spec, in_spec, in_spec],
            out_specs=pl.BlockSpec((_ACC_ROWS, LANE), lambda c, i: (c, 0)),
        ),
        compiler_params=pltpu.CompilerParams(
            dimension_semantics=("parallel", "arbitrary")),
    )(y2, m2, v2)

    # Tiny epilogue on (n_split*8, 128) partials: full reduce, mean, +1.
    return jnp.sum(partials) / n + 1.0


def _reference_nll(y, mean, var):
    return jnp.mean(0.5 * jnp.log(var) + 0.5 * (y - mean) ** 2 / var) + 1.0


if __name__ == "__main__":
    key = jax.random.PRNGKey(0)
    ky, km, kv = jax.random.split(key, 3)

    shape = (2, 4, 16, 16)  # NCHW, small
    y = jax.random.normal(ky, shape, dtype=jnp.float32)
    mean = jax.random.normal(km, shape, dtype=jnp.float32)
    # var must be strictly positive
    var = jax.nn.softplus(jax.random.normal(kv, shape, dtype=jnp.float32)) + 0.1

    loss = custom_nll(y, mean, var)
    jax.block_until_ready(loss)

    # Mirror the PyTorch module's raise-on-NaN after the (already required)
    # device sync, so the jitted hot path never blocks on a host readback.
    # TODO(synk): the module also prints log(var) and (y-mean)^2/var on NaN;
    # omitted here to keep the kernel path jittable.
    if bool(jnp.isnan(loss)):
        raise ValueError('There is Nan in loss')

    ref = _reference_nll(y, mean, var)
    assert jnp.allclose(loss, ref, rtol=1e-5, atol=1e-5), (loss, ref)

    print("KERNEL_OK")
</pallas_src>

<mosaic_0001>
module attributes {stable_mosaic.version = 11 : i64} {
  func.func @_nll_kernel(%arg0: i32, %arg1: i32, %arg2: memref<16x128xf32, #tpu.memory_space<vmem>>, %arg3: memref<16x128xf32, #tpu.memory_space<vmem>>, %arg4: memref<16x128xf32, #tpu.memory_space<vmem>>, %arg5: memref<8x128xf32, #tpu.memory_space<vmem>>) attributes {dimension_semantics = [#tpu.dimension_semantics<parallel>, #tpu.dimension_semantics<arbitrary>], iteration_bounds = array<i64: 1, 1>, scalar_prefetch = 0 : i64, scratch_operands = 0 : i64, tpu.core_type = #tpu.core_type<tc>, window_params = [{transform_indices = @transform_0, window_bounds = array<i64: 16, 128>}, {transform_indices = @transform_1, window_bounds = array<i64: 16, 128>}, {transform_indices = @transform_2, window_bounds = array<i64: 16, 128>}, {transform_indices = @transform_3, window_bounds = array<i64: 8, 128>}]} {
    %c0_i32 = arith.constant 0 : i32
    %0 = arith.cmpi eq, %arg1, %c0_i32 : i32
    %1 = arith.extui %0 : i1 to i32
    %c0_i32_0 = arith.constant 0 : i32
    %2 = arith.cmpi ne, %1, %c0_i32_0 : i32
    scf.if %2 {
      %cst_13 = arith.constant 0.000000e+00 : f32
      %34 = vector.broadcast %cst_13 : f32 to vector<8x128xf32>
      %c0_14 = arith.constant 0 : index
      %c0_15 = arith.constant 0 : index
      %35 = vector.load %arg5[%c0_14, %c0_15] : memref<8x128xf32, #tpu.memory_space<vmem>>, vector<8x128xf32>
      tpu.vector_store %arg5[%c0_14, %c0_15], %34 {strides = array<i32>} : memref<8x128xf32, #tpu.memory_space<vmem>>, vector<8x128xf32>,
    } else {
    }
    %c0 = arith.constant 0 : index
    %c0_1 = arith.constant 0 : index
    %3 = vector.load %arg2[%c0, %c0_1] : memref<16x128xf32, #tpu.memory_space<vmem>>, vector<16x128xf32>
    %c0_2 = arith.constant 0 : index
    %c0_3 = arith.constant 0 : index
    %4 = vector.load %arg3[%c0_2, %c0_3] : memref<16x128xf32, #tpu.memory_space<vmem>>, vector<16x128xf32>
    %c0_4 = arith.constant 0 : index
    %c0_5 = arith.constant 0 : index
    %5 = vector.load %arg4[%c0_4, %c0_5] : memref<16x128xf32, #tpu.memory_space<vmem>>, vector<16x128xf32>
    %6 = arith.subf %3, %4 : vector<16x128xf32>
    %7 = math.log %5 : vector<16x128xf32>
    %cst = arith.constant 5.000000e-01 : f32
    %8 = vector.broadcast %cst : f32 to vector<16x128xf32>
    %9 = arith.mulf %8, %7 : vector<16x128xf32>
    %10 = arith.mulf %6, %6 : vector<16x128xf32>
    %cst_6 = arith.constant 5.000000e-01 : f32
    %11 = vector.broadcast %cst_6 : f32 to vector<16x128xf32>
    %12 = arith.mulf %11, %10 : vector<16x128xf32>
    %13 = arith.divf %12, %5 : vector<16x128xf32>
    %14 = arith.addf %9, %13 : vector<16x128xf32>
    %c1_i32 = arith.constant 1 : i32
    %15 = arith.muli %arg0, %c1_i32 : i32
    %16 = arith.addi %15, %arg1 : i32
    %c16_i32 = arith.constant 16 : i32
    %17 = arith.muli %16, %c16_i32 : i32
    %18 = tpu.iota {dimensions = array<i32: 0>} : vector<16x128xi32>
    %19 = vector.broadcast %17 : i32 to vector<16x128xi32>
    %20 = arith.addi %19, %18 : vector<16x128xi32>
    %21 = tpu.iota {dimensions = array<i32: 1>} : vector<16x128xi32>
    %c128_i32 = arith.constant 128 : i32
    %22 = vector.broadcast %c128_i32 : i32 to vector<16x128xi32>
    %23 = arith.muli %20, %22 : vector<16x128xi32>
    %24 = arith.addi %23, %21 : vector<16x128xi32>
    %c2048_i32 = arith.constant 2048 : i32
    %25 = vector.broadcast %c2048_i32 : i32 to vector<16x128xi32>
    %26 = arith.cmpi slt, %24, %25 : vector<16x128xi32>
    %cst_7 = arith.constant 0.000000e+00 : f32
    %27 = vector.broadcast %cst_7 : f32 to vector<16x128xf32>
    %28 = arith.select %26, %14, %27 : vector<16x128xi1>, vector<16x128xf32>
    %c0_8 = arith.constant 0 : index
    %c0_9 = arith.constant 0 : index
    %29 = vector.load %arg5[%c0_8, %c0_9] : memref<8x128xf32, #tpu.memory_space<vmem>>, vector<8x128xf32>
    %30 = vector.shape_cast %28 : vector<16x128xf32> to vector<2x8x128xf32>
    %cst_10 = arith.constant dense<0.000000e+00> : vector<8x128xf32>
    %31 = vector.multi_reduction <add>, %30, %cst_10 [0] : vector<2x8x128xf32> to vector<8x128xf32>
    %32 = arith.addf %29, %31 : vector<8x128xf32>
    %c0_11 = arith.constant 0 : index
    %c0_12 = arith.constant 0 : index
    %33 = vector.load %arg5[%c0_11, %c0_12] : memref<8x128xf32, #tpu.memory_space<vmem>>, vector<8x128xf32>
    tpu.vector_store %arg5[%c0_11, %c0_12], %32 {strides = array<i32>} : memref<8x128xf32, #tpu.memory_space<vmem>>, vector<8x128xf32>,
    return
  }
  func.func @transform_0(%arg0: i32, %arg1: i32) -> (i32, i32) {
    %c1_i32 = arith.constant 1 : i32
    %0 = arith.muli %arg0, %c1_i32 : i32
    %1 = arith.addi %0, %arg1 : i32
    %c0_i32 = arith.constant 0 : i32
    %2 = arith.minsi %1, %c0_i32 : i32
    %c0_i32_0 = arith.constant 0 : i32
    %c0_i32_1 = arith.constant 0 : i32
    return %2, %c0_i32_0 : i32, i32
  }
  func.func @transform_1(%arg0: i32, %arg1: i32) -> (i32, i32) {
    %c1_i32 = arith.constant 1 : i32
    %0 = arith.muli %arg0, %c1_i32 : i32
    %1 = arith.addi %0, %arg1 : i32
    %c0_i32 = arith.constant 0 : i32
    %2 = arith.minsi %1, %c0_i32 : i32
    %c0_i32_0 = arith.constant 0 : i32
    %c0_i32_1 = arith.constant 0 : i32
    return %2, %c0_i32_0 : i32, i32
  }
  func.func @transform_2(%arg0: i32, %arg1: i32) -> (i32, i32) {
    %c1_i32 = arith.constant 1 : i32
    %0 = arith.muli %arg0, %c1_i32 : i32
    %1 = arith.addi %0, %arg1 : i32
    %c0_i32 = arith.constant 0 : i32
    %2 = arith.minsi %1, %c0_i32 : i32
    %c0_i32_0 = arith.constant 0 : i32
    %c0_i32_1 = arith.constant 0 : i32
    return %2, %c0_i32_0 : i32, i32
  }
  func.func @transform_3(%arg0: i32, %arg1: i32) -> (i32, i32) {
    %c0_i32 = arith.constant 0 : i32
    %c0_i32_0 = arith.constant 0 : i32
    return %arg0, %c0_i32 : i32, i32
  }
}

</mosaic_0001>

<bundles_post_ra>
// kernel: custom_nll.1
= control target key start
LH: loop header
LB: loop body
LE: loop exit
PB: predicated region body
PF: predicated region fallthrough
CT: control target
= control target key end

     0   :  { %v141_v0 = vlaneseq  ;;  %s233_s2 = inlined_call_operand.vmem [shape: f32[16,128], index: 2, kind: input, shape index: {}]   ;;  %s234_s0 = inlined_call_operand.vmem [shape: f32[16,128], index: 0, kind: input, shape index: {}]   ;;  %s235_s1 = inlined_call_operand.vmem [shape: f32[16,128], index: 1, kind: input, shape index: {}]   ;;  %s236_s3 = inlined_call_operand.vmem [shape: f32[8,128], index: 3, kind: output, shape index: {}]  }
   0x1   :  { %v119_v1 = vld [vmem:[%s233_s2] sm:$0xff]  ;;  %v120_v2 = vld [vmem:[%s233_s2 + $0x8] sm:$0xff] }
   0x2   :  { %184 = vlog2.f32 %v119_v1  ;;  %v115_v3 = vld [vmem:[%s234_s0] sm:$0xff]  ;;  %v116_v5 = vld [vmem:[%s234_s0 + $0x8] sm:$0xff]  ;;  %v142_v7 = vshrl.u32 %v141_v0, 7  ;;  %v148_v13 = vand.u32 127, %v141_v0 }
   0x3   :  { %v117_v4 = vld [vmem:[%s235_s1] sm:$0xff]  ;;  %186 = vlog2.f32 %v120_v2  ;;  %v118_v6 = vld [vmem:[%s235_s1 + $0x8] sm:$0xff] }
   0x4   :  { %188 = vrcp.f32 %v119_v1  ;;  %v121_v8 = vsub.f32 %v115_v3, %v117_v4  ;;  %v122_v9 = vsub.f32 %v116_v5, %v118_v6  ;;  %v143_v10 = vadd.s32 8, %v142_v7 }
   0x5   :  { %190 = vrcp.f32 %v120_v2  ;;  %v149_v14 = vmul.u32 128, %v142_v7 }
   0x6   :  { %v129_v11 = vmul.f32 %v121_v8, %v121_v8  ;;  %v130_v12 = vmul.f32 %v122_v9, %v122_v9  ;;  %v150_v15 = vmul.u32 128, %v143_v10 }
   0x7   :  { %v151_v19 = vadd.s32 %v149_v14, %v148_v13 }
   0x8   :  { %v131_v16 = vmul.f32 0.5, %v129_v11  ;;  %v132_v18 = vmul.f32 0.5, %v130_v12  ;;  %v152_v22 = vadd.s32 %v150_v15, %v148_v13 }
   0x9   :  { %vm153_vm0 = vcmp.lt.s32.totalorder %v151_v19, 2048 }
   0xa   :  { %vm154_vm1 = vcmp.lt.s32.totalorder %v152_v22, 2048 }
   0xf   :  { %v185_v17 = vpop.eup %184 }
  0x10   :  { %v187_v20 = vpop.eup %186  ;;  %v124_v21 = vmul.f32 0.6931472, %v185_v17 }
  0x11   :  { %v189_v23 = vpop.eup %188  ;;  %v126_v24 = vmul.f32 0.6931472, %v187_v20 }
  0x12   :  { %v191_v25 = vpop.eup %190  ;;  %v127_v26 = vmul.f32 0.5, %v124_v21  ;;  %v134_v27 = vmul.f32 %v189_v23, %v131_v16 }
  0x13   :  { %v128_v28 = vmul.f32 0.5, %v126_v24  ;;  %v136_v29 = vmul.f32 %v191_v25, %v132_v18 }
  0x14   :  { %v137_v30 = vadd.f32 %v134_v27, %v127_v26 }
  0x15   :  { %v138_v31 = vadd.f32 %v136_v29, %v128_v28 }
  0x16   :  { %v155_v32 = vsel %vm153_vm0, %v137_v30, 0.0 }
  0x17   :  { %v156_v33 = vsel %vm154_vm1, %v138_v31, 0.0 }
  0x18   :  { %v158_v34 = vadd.f32 %v156_v33, %v155_v32 }
  0x1a   :  { %160 = vst [vmem:[%s236_s3] sm:$0xff] %v158_v34 }

</bundles_post_ra>
